<compile_context>
chip_gen: v5e
topology: v5e:2x2
jax: 0.10.0
libtpu: 0.0.40
codegen_flags: <defaults>
</compile_context>

<pallas_src>
import jax
import jax.numpy as jnp
from jax.experimental import pallas as pl
from jax.experimental.pallas import tpu as pltpu


def _round_up(n: int, m: int) -> int:
    return (n + m - 1) // m * m


def _pick_tile(total: int, max_tile: int, quantum: int) -> int:
    """Largest multiple of `quantum` that is <= max_tile and divides `total`."""
    best = quantum
    t = quantum
    while t <= min(max_tile, total):
        if total % t == 0:
            best = t
        t += quantum
    return best


def generator_kernel(x_ref, w1_ref, b1_ref, w2_ref, b2_ref, o_ref, h_ref):
    j = pl.program_id(1)

    # First linear layer: computed once per batch tile (j == 0), kept in VMEM
    # scratch as bf16 (MXU operand dtype for the second matmul).
    @pl.when(j == 0)
    def _():
        acc1 = jnp.dot(x_ref[...], w1_ref[...],
                       preferred_element_type=jnp.float32)
        h_ref[...] = (acc1 + b1_ref[...]).astype(h_ref.dtype)

    # Second linear layer: one lane-dense N-stripe of the output per step.
    acc2 = jnp.dot(h_ref[...], w2_ref[...],
                   preferred_element_type=jnp.float32)
    o_ref[...] = (acc2 + b2_ref[...]).astype(o_ref.dtype)


def generator_forward(x, w1, b1, w2, b2, *,
                      block_b=128, block_n=512,
                      compute_dtype=jnp.bfloat16):
    """y = fc2(fc1(x)) with fc weights stored as (in_features, out_features)."""
    B, L = x.shape
    O = w1.shape[1]
    assert w1.shape == (L, O) and w2.shape == (O, L)
    assert b1.shape == (1, O) and b2.shape == (1, L)

    # ---- Lane-dense padding: features -> multiples of 128, batch -> mult of 8 ----
    Lp = _round_up(L, 128)          # fc1 input dim / fc2 output dim
    Op = _round_up(O, 128)          # fc1 output dim / fc2 input dim
    tn = _pick_tile(Lp, block_n, 128)               # output-feature tile
    tb = _pick_tile(_round_up(B, 8), block_b, 8)    # batch tile
    Bp = _round_up(B, tb)

    x_p = jnp.pad(x, ((0, Bp - B), (0, Lp - L))).astype(compute_dtype)
    w1_p = jnp.pad(w1, ((0, Lp - L), (0, Op - O))).astype(compute_dtype)
    b1_p = jnp.pad(b1, ((0, 0), (0, Op - O))).astype(jnp.float32)
    w2_p = jnp.pad(w2, ((0, Op - O), (0, Lp - L))).astype(compute_dtype)
    b2_p = jnp.pad(b2, ((0, 0), (0, Lp - L))).astype(jnp.float32)

    grid = (Bp // tb, Lp // tn)

    # Advisory cost so XLA does not treat the custom call as free.
    bytes_accessed = (x_p.size * x_p.dtype.itemsize
                      + w1_p.size * w1_p.dtype.itemsize
                      + b1_p.size * b1_p.dtype.itemsize
                      + w2_p.size * w2_p.dtype.itemsize
                      + b2_p.size * b2_p.dtype.itemsize
                      + Bp * Lp * 4)
    cost = pl.CostEstimate(flops=2 * Bp * Lp * Op + 2 * Bp * Op * Lp,
                           transcendentals=0,
                           bytes_accessed=bytes_accessed)

    out = pl.pallas_call(
        generator_kernel,
        out_shape=jax.ShapeDtypeStruct((Bp, Lp), jnp.float32),
        grid_spec=pltpu.PrefetchScalarGridSpec(
            num_scalar_prefetch=0,
            grid=grid,
            in_specs=[
                pl.BlockSpec((tb, Lp), lambda i, j: (i, 0)),   # x batch tile (full K)
                pl.BlockSpec((Lp, Op), lambda i, j: (0, 0)),   # w1 (resident)
                pl.BlockSpec((1, Op), lambda i, j: (0, 0)),    # b1 (resident)
                pl.BlockSpec((Op, tn), lambda i, j: (0, j)),   # w2 N-stripe
                pl.BlockSpec((1, tn), lambda i, j: (0, j)),    # b2 N-stripe
            ],
            out_specs=pl.BlockSpec((tb, tn), lambda i, j: (i, j)),
            scratch_shapes=[pltpu.VMEM((tb, Op), compute_dtype)],  # h = fc1(x) tile
        ),
        compiler_params=pltpu.CompilerParams(
            # Batch tiles are independent -> megacore sharding on v7x.
            # j axis carries the h scratch -> must stay sequential ("arbitrary").
            dimension_semantics=("parallel", "arbitrary"),
            vmem_limit_bytes=64 * 1024 * 1024,
        ),
        cost_estimate=cost,
    )(x_p, w1_p, b1_p, w2_p, b2_p)

    return out[:B, :L]


def init_linear_params(key, in_features, out_features, dtype=jnp.float32):
    # Deterministic init mimicking PyTorch nn.Linear default:
    # U(-1/sqrt(in_features), 1/sqrt(in_features)) for weight and bias.
    kw, kb = jax.random.split(key)
    bound = 1.0 / jnp.sqrt(jnp.array(in_features, dtype))
    # Stored as (in, out) so the math is x @ W (equivalent to PyTorch x @ W_pt.T).
    w = jax.random.uniform(kw, (in_features, out_features), dtype,
                           minval=-bound, maxval=bound)
    b = jax.random.uniform(kb, (1, out_features), dtype,
                           minval=-bound, maxval=bound)
    return w, b


if __name__ == "__main__":
    # Small, self-consistent shapes: latent_dim == output_dim (as in the module).
    batch = 8
    latent_dim = 32
    output_dim = latent_dim

    key = jax.random.PRNGKey(0)
    kx, k1, k2 = jax.random.split(key, 3)

    x = jax.random.normal(kx, (batch, latent_dim), jnp.float32)
    w1, b1 = init_linear_params(k1, latent_dim, output_dim)
    w2, b2 = init_linear_params(k2, output_dim, latent_dim)

    fwd = jax.jit(generator_forward,
                  static_argnames=("block_b", "block_n", "compute_dtype"))
    out = fwd(x, w1, b1, w2, b2)
    out = jax.block_until_ready(out)

    # Reference check in plain JAX (f32 — same math as the PyTorch module).
    ref = (x @ w1 + b1) @ w2 + b2
    assert out.shape == (batch, latent_dim)
    # bf16 MXU operands with f32 accumulation: allow bf16-level tolerance.
    assert jnp.allclose(out, ref, atol=3e-2, rtol=3e-2), \
        float(jnp.max(jnp.abs(out - ref)))

    print("KERNEL_OK")
</pallas_src>

<mosaic_0001>
module attributes {stable_mosaic.version = 11 : i64} {
  func.func @generator_kernel(%arg0: i32, %arg1: i32, %arg2: memref<8x128xbf16, #tpu.memory_space<vmem>>, %arg3: memref<128x128xbf16, #tpu.memory_space<vmem>>, %arg4: memref<1x128xf32, #tpu.memory_space<vmem>>, %arg5: memref<128x128xbf16, #tpu.memory_space<vmem>>, %arg6: memref<1x128xf32, #tpu.memory_space<vmem>>, %arg7: memref<8x128xf32, #tpu.memory_space<vmem>>, %arg8: memref<8x128xbf16, #tpu.memory_space<vmem>>) attributes {dimension_semantics = [#tpu.dimension_semantics<parallel>, #tpu.dimension_semantics<arbitrary>], iteration_bounds = array<i64: 1, 1>, scalar_prefetch = 0 : i64, scratch_operands = 1 : i64, tpu.core_type = #tpu.core_type<tc>, window_params = [{transform_indices = @transform_0, window_bounds = array<i64: 8, 128>}, {pipeline_mode = #tpu.pipeline_mode<synchronous>, transform_indices = @transform_1, window_bounds = array<i64: 128, 128>}, {pipeline_mode = #tpu.pipeline_mode<synchronous>, transform_indices = @transform_2, window_bounds = array<i64: 1, 128>}, {transform_indices = @transform_3, window_bounds = array<i64: 128, 128>}, {transform_indices = @transform_4, window_bounds = array<i64: 1, 128>}, {transform_indices = @transform_5, window_bounds = array<i64: 8, 128>}]} {
    %c0_i32 = arith.constant 0 : i32
    %0 = arith.cmpi eq, %arg1, %c0_i32 : i32
    %1 = arith.extui %0 : i1 to i32
    %c0_i32_0 = arith.constant 0 : i32
    %2 = arith.cmpi ne, %1, %c0_i32_0 : i32
    scf.if %2 {
      %c0_8 = arith.constant 0 : index
      %c0_9 = arith.constant 0 : index
      %10 = vector.load %arg2[%c0_8, %c0_9] : memref<8x128xbf16, #tpu.memory_space<vmem>>, vector<8x128xbf16>
      %c0_10 = arith.constant 0 : index
      %c0_11 = arith.constant 0 : index
      %11 = vector.load %arg3[%c0_10, %c0_11] : memref<128x128xbf16, #tpu.memory_space<vmem>>, vector<128x128xbf16>
      %cst_12 = arith.constant dense<0.000000e+00> : vector<8x128xf32>
      %12 = tpu.matmul %10, %11, %cst_12 {dimension_numbers = #tpu.dot_dimension_numbers<[1], [0], [0], [1], [0, 0, 1, 1], [], []>} : vector<8x128xbf16>, vector<128x128xbf16>, vector<8x128xf32> -> vector<8x128xf32>
      %c0_13 = arith.constant 0 : index
      %c0_14 = arith.constant 0 : index
      %13 = vector.load %arg4[%c0_13, %c0_14] : memref<1x128xf32, #tpu.memory_space<vmem>>, vector<1x128xf32>
      %14 = vector.broadcast %13 : vector<1x128xf32> to vector<8x128xf32>
      %15 = arith.addf %12, %14 : vector<8x128xf32>
      %16 = arith.truncf %15 : vector<8x128xf32> to vector<8x128xbf16>
      %c0_15 = arith.constant 0 : index
      %c0_16 = arith.constant 0 : index
      %17 = vector.load %arg8[%c0_15, %c0_16] : memref<8x128xbf16, #tpu.memory_space<vmem>>, vector<8x128xbf16>
      tpu.vector_store %arg8[%c0_15, %c0_16], %16 {strides = array<i32>} : memref<8x128xbf16, #tpu.memory_space<vmem>>, vector<8x128xbf16>,
    } else {
    }
    %c0 = arith.constant 0 : index
    %c0_1 = arith.constant 0 : index
    %3 = vector.load %arg8[%c0, %c0_1] : memref<8x128xbf16, #tpu.memory_space<vmem>>, vector<8x128xbf16>
    %c0_2 = arith.constant 0 : index
    %c0_3 = arith.constant 0 : index
    %4 = vector.load %arg5[%c0_2, %c0_3] : memref<128x128xbf16, #tpu.memory_space<vmem>>, vector<128x128xbf16>
    %cst = arith.constant dense<0.000000e+00> : vector<8x128xf32>
    %5 = tpu.matmul %3, %4, %cst {dimension_numbers = #tpu.dot_dimension_numbers<[1], [0], [0], [1], [0, 0, 1, 1], [], []>} : vector<8x128xbf16>, vector<128x128xbf16>, vector<8x128xf32> -> vector<8x128xf32>
    %c0_4 = arith.constant 0 : index
    %c0_5 = arith.constant 0 : index
    %6 = vector.load %arg6[%c0_4, %c0_5] : memref<1x128xf32, #tpu.memory_space<vmem>>, vector<1x128xf32>
    %7 = vector.broadcast %6 : vector<1x128xf32> to vector<8x128xf32>
    %8 = arith.addf %5, %7 : vector<8x128xf32>
    %c0_6 = arith.constant 0 : index
    %c0_7 = arith.constant 0 : index
    %9 = vector.load %arg7[%c0_6, %c0_7] : memref<8x128xf32, #tpu.memory_space<vmem>>, vector<8x128xf32>
    tpu.vector_store %arg7[%c0_6, %c0_7], %8 {strides = array<i32>} : memref<8x128xf32, #tpu.memory_space<vmem>>, vector<8x128xf32>,
    return
  }
  func.func @transform_0(%arg0: i32, %arg1: i32) -> (i32, i32) {
    %c0_i32 = arith.constant 0 : i32
    %c0_i32_0 = arith.constant 0 : i32
    return %arg0, %c0_i32 : i32, i32
  }
  func.func @transform_1(%arg0: i32, %arg1: i32) -> (i32, i32) {
    %c0_i32 = arith.constant 0 : i32
    %c0_i32_0 = arith.constant 0 : i32
    %c0_i32_1 = arith.constant 0 : i32
    return %c0_i32, %c0_i32_0 : i32, i32
  }
  func.func @transform_2(%arg0: i32, %arg1: i32) -> (i32, i32) {
    %c0_i32 = arith.constant 0 : i32
    %c0_i32_0 = arith.constant 0 : i32
    %c0_i32_1 = arith.constant 0 : i32
    return %c0_i32, %c0_i32_0 : i32, i32
  }
  func.func @transform_3(%arg0: i32, %arg1: i32) -> (i32, i32) {
    %c0_i32 = arith.constant 0 : i32
    %c0_i32_0 = arith.constant 0 : i32
    return %c0_i32, %arg1 : i32, i32
  }
  func.func @transform_4(%arg0: i32, %arg1: i32) -> (i32, i32) {
    %c0_i32 = arith.constant 0 : i32
    %c0_i32_0 = arith.constant 0 : i32
    return %c0_i32, %arg1 : i32, i32
  }
  func.func @transform_5(%arg0: i32, %arg1: i32) -> (i32, i32) {
    %c0_i32 = arith.constant 0 : i32
    return %arg0, %arg1 : i32, i32
  }
}

</mosaic_0001>

<bundles_post_ra>
// kernel: generator_forward.1
= control target key start
LH: loop header
LB: loop body
LE: loop exit
PB: predicated region body
PF: predicated region fallthrough
CT: control target
= control target key end

     0   :  { %s408_s0 = inlined_call_operand.vmem [shape: bf16[8,128], index: 0, kind: input, shape index: {}]   ;;  %s409_s1 = inlined_call_operand.vmem [shape: bf16[128,128], index: 1, kind: input, shape index: {}]   ;;  %s410_s2 = inlined_call_operand.vmem [shape: f32[1,128], index: 2, kind: input, shape index: {}]   ;;  %s411_s3 = inlined_call_operand.vmem [shape: bf16[128,128], index: 3, kind: input, shape index: {}]   ;;  %s412_s4 = inlined_call_operand.vmem [shape: f32[1,128], index: 4, kind: input, shape index: {}]   ;;  %s413_s5 = inlined_call_operand.hbm [shape: f32[8,128], index: 5, kind: output, shape index: {}]  }
   0x1   :  { %v279_v0 = vld [vmem:[%s409_s1 + $0x38] sm:$0xff]  ;;  %v278_v1 = vld [vmem:[%s409_s1 + $0x30] sm:$0xff] }
   0x2   :  { %94 = vmatpush.bf16.msra.mxu0 %v279_v0  ;;  %v287_v2 = vld [vmem:[%s411_s3 + $0x38] sm:$0xff]  ;;  %v286_v3 = vld [vmem:[%s411_s3 + $0x30] sm:$0xff] }
   0x3   :  { %178 = vmatpush.bf16.msra.mxu1 %v287_v2 }
   0x4   :  { %10 = vsyncpa [#allocation4], 0  ;;  %v277_v4 = vld [vmem:[%s409_s1 + $0x28] sm:$0xff]  ;;  %v276_v6 = vld [vmem:[%s409_s1 + $0x20] sm:$0xff]  ;;  %s317_s29 = smov [#allocation3]   ;;  %s199_s7 = sshll.u32 %s413_s5, 4  ;;  %s200_s7 = int_to_ptr.hbm [resolvable:$true] %s199_s7 }
   0x5   :  { %v285_v5 = vld [vmem:[%s411_s3 + $0x28] sm:$0xff]  ;;  %v284_v7 = vld [vmem:[%s411_s3 + $0x20] sm:$0xff]  ;;  %v275_v8 = vld [vmem:[%s409_s1 + $0x18] sm:$0xff]  ;;  %s197_s30 = sshll.u32 %s317_s29, 4  ;;  %s198_s30 = int_to_ptr.vmem [resolvable:$true] %s197_s30 }
   0x6   :  { %95 = vmatpush.bf16.msra.mxu0 %v278_v1  ;;  %v283_v9 = vld [vmem:[%s411_s3 + $0x18] sm:$0xff]  ;;  %v274_v10 = vld [vmem:[%s409_s1 + $0x10] sm:$0xff]  ;;  %v273_v11 = vld [vmem:[%s409_s1 + $0x8] sm:$0xff] }
   0x7   :  { %179 = vmatpush.bf16.msra.mxu1 %v286_v3  ;;  %v272_v12 = vld [vmem:[%s409_s1] sm:$0xff]  ;;  %v282_v14 = vld [vmem:[%s411_s3 + $0x10] sm:$0xff]  ;;  %v281_v15 = vld [vmem:[%s411_s3 + $0x8] sm:$0xff] }
   0x8   :  { %v25_v13 = vld [vmem:[%s408_s0] sm:$0xf] }
   0x9   :  { %v280_v16 = vld [vmem:[%s411_s3] sm:$0xff] }
   0xa   :  { %96 = vmatpush.bf16.msra.mxu0 %v277_v4  ;;  %v289_v17 = vld [vmem:[%s410_s2] ss:$0 sm:$0xff] }
   0xb   :  { %180 = vmatpush.bf16.msra.mxu1 %v285_v5  ;;  %v290_v23 = vld [vmem:[%s412_s4] ss:$0 sm:$0xff] }
   0xe   :  { %97 = vmatpush.bf16.msra.mxu0 %v276_v6 }
   0xf   :  { %181 = vmatpush.bf16.msra.mxu1 %v284_v7 }
  0x12   :  { %98 = vmatpush.bf16.msra.mxu0 %v275_v8 }
  0x13   :  { %182 = vmatpush.bf16.msra.mxu1 %v283_v9 }
  0x16   :  { %99 = vmatpush.bf16.msra.mxu0 %v274_v10 }
  0x17   :  { %183 = vmatpush.bf16.msra.mxu1 %v282_v14 }
  0x1a   :  { %100 = vmatpush.bf16.msra.mxu0 %v273_v11 }
  0x1b   :  { %184 = vmatpush.bf16.msra.mxu1 %v281_v15 }
  0x1e   :  { %101 = vmatpush.bf16.msra.mxu0 %v272_v12 }
  0x1f   :  { %185 = vmatpush.bf16.msra.mxu1 %v280_v16 }
  0x21   :  { %102 = vmatmul.bf16.vlgmr.msra.gmra.mxu0 %v25_v13 }
  0x9e   :  { %v103_v18 = vpop.f32.mrf.mxu0 }
  0x9f   :  { %v104_v19 = vadd.f32 %v289_v17, %v103_v18 }
  0xa1   :  { %v107_v20 = vpack.c.bf16 %v104_v19, %v104_v19 }
  0xa3   :  { %108 = vst [vmem:[#allocation2] sm:$0xf] %v107_v20 }
  0xa6   :  { %v105_v21 = vpop.f32.mrf.mxu0 }
  0xaa   :  { %v109_v22 = vld [vmem:[#allocation2] sm:$0xf] }
  0xab   :  { %186 = vmatmul.bf16.vlgmr.msra.gmra.mxu1 %v109_v22 }
 0x128   :  { %v187_v24 = vpop.f32.mrf.mxu1 }
 0x129   :  { %v188_v25 = vadd.f32 %v290_v23, %v187_v24 }
 0x12b   :  { %191 = vst [vmem:[#allocation3] sm:$0xff] %v188_v25 }
 0x12c   :  { %202 = dma.vmem_to_hbm [thread:$0]  %s198_s30, 128, %s200_s7, [#allocation4]  }
 0x130   :  { %v189_v26 = vpop.f32.mrf.mxu1 }
 0x131   :  { %315 = dma.done.wait [#allocation4], 128  }
 0x132   :  { %316 = vsyncadd [#allocation4], 4294967168 }
 0x133   :  { %207 = vsyncpa [#allocation4], 1 }

</bundles_post_ra>
